<compile_context>
chip_gen: v5e
topology: v5e:2x2
jax: 0.10.0
libtpu: 0.0.40
codegen_flags: <defaults>
</compile_context>

<pallas_src>
import jax
import jax.numpy as jnp
from jax.experimental import pallas as pl
from jax.experimental.pallas import tpu as pltpu


def _round_up(n, m):
    return ((n + m - 1) // m) * m


def _netc_kernel(x_ref, w1_ref, b1_ref, w2_ref, b2_ref, out_ref):
    # Fused MLP hot path: matmul -> bias -> ReLU -> matmul -> bias, all in VMEM.
    x = x_ref[...].astype(jnp.bfloat16)                        # (TB, H) bf16 MXU operand
    h = jnp.dot(x, w1_ref[...], preferred_element_type=jnp.float32)
    h = jnp.maximum(h + b1_ref[...], 0.0)                      # bias + ReLU in f32
    o = jnp.dot(h.astype(jnp.bfloat16), w2_ref[...],
                preferred_element_type=jnp.float32)
    o = o + b2_ref[...]                                        # f32 bias broadcast
    out_ref[...] = o.astype(out_ref.dtype)


def prepare_netc_params(w1, b1, w2, b2):
    """One-time parameter prep (call ONCE, not per forward).

    w1: (2*ndf, 2*ndf), w2: (2*ndf, nclasses) stored as (in_features, out_features).
    Weights are cast to bf16 MXU operands; biases become (1, F) f32 rows so the
    kernel can broadcast them without any reshaping/padding per call.
    """
    return (jnp.asarray(w1, jnp.bfloat16),
            jnp.asarray(b1, jnp.float32).reshape(1, -1),
            jnp.asarray(w2, jnp.bfloat16),
            jnp.asarray(b2, jnp.float32).reshape(1, -1))


def netc_forward(x, params, *, block_b=2048):
    """x: (B, 2*ndf) -> (B, nclasses) in x.dtype.  `params` from prepare_netc_params."""
    w1, b1, w2, b2 = params
    B, H = x.shape
    C = w2.shape[1]

    # Balanced batch tiling without any HBM padding:
    #   - small B -> a single full-array block (always layout-legal);
    #   - large B -> balanced tiles rounded to 8 sublanes; the ragged last
    #     block's out-of-bounds output rows are masked by Pallas.
    # For B >= 1024 force >= 2 grid steps so "parallel" can feed both v7x
    # TensorCores (harmless ~0.35 us extra step cost on v5e/v6e).
    num_steps = pl.cdiv(B, block_b)
    if B >= 1024:
        num_steps = max(num_steps, 2)
    TB = _round_up(pl.cdiv(B, num_steps), 8)
    if TB >= B:
        TB = B                      # single block equal to the full batch dim
    grid_b = pl.cdiv(B, TB)

    return pl.pallas_call(
        _netc_kernel,
        out_shape=jax.ShapeDtypeStruct((B, C), x.dtype),
        grid=(grid_b,),
        in_specs=[
            pl.BlockSpec((TB, H), lambda i: (i, 0)),   # batched input tile (f32, cast in-kernel)
            pl.BlockSpec((H, H), lambda i: (0, 0)),    # w1 resident in VMEM (bf16)
            pl.BlockSpec((1, H), lambda i: (0, 0)),    # b1 resident (f32)
            pl.BlockSpec((H, C), lambda i: (0, 0)),    # w2 resident (bf16)
            pl.BlockSpec((1, C), lambda i: (0, 0)),    # b2 resident (f32)
        ],
        out_specs=pl.BlockSpec((TB, C), lambda i: (i, 0)),
        compiler_params=pltpu.CompilerParams(
            dimension_semantics=("parallel",)),
    )(x, w1, b1, w2, b2)


if __name__ == "__main__":
    # Module hyperparameters (small, consistent with the forward pass).
    ndf = 16          # -> hidden width 2*ndf = 32
    nclasses = 10
    batch = 2
    H = 2 * ndf

    key = jax.random.PRNGKey(0)
    kx, kw1, kb1, kw2, kb2 = jax.random.split(key, 5)

    x = jax.random.normal(kx, (batch, H), dtype=jnp.float32)

    # Deterministic parameter init (PyTorch Linear default-ish uniform scale).
    lim = 1.0 / jnp.sqrt(H)
    w1 = jax.random.uniform(kw1, (H, H), minval=-lim, maxval=lim, dtype=jnp.float32)
    b1 = jax.random.uniform(kb1, (H,), minval=-lim, maxval=lim, dtype=jnp.float32)
    w2 = jax.random.uniform(kw2, (H, nclasses), minval=-lim, maxval=lim, dtype=jnp.float32)
    b2 = jax.random.uniform(kb2, (nclasses,), minval=-lim, maxval=lim, dtype=jnp.float32)

    params = prepare_netc_params(w1, b1, w2, b2)   # one-time prep, outside the forward

    out = netc_forward(x, params)
    jax.block_until_ready(out)
    assert out.shape == (batch, nclasses)
    assert out.dtype == x.dtype

    # Reference that mirrors the kernel's bf16-operand / f32-accumulate math.
    xb = x.astype(jnp.bfloat16).astype(jnp.float32)
    w1b = w1.astype(jnp.bfloat16).astype(jnp.float32)
    w2b = w2.astype(jnp.bfloat16).astype(jnp.float32)
    hb = jnp.maximum(xb @ w1b + b1, 0.0)
    hb = hb.astype(jnp.bfloat16).astype(jnp.float32)
    ref_bf16 = hb @ w2b + b2
    assert jnp.allclose(out, ref_bf16, atol=1e-4, rtol=1e-4)

    # Loose check against the pure f32 PyTorch-equivalent semantics
    # (intentional bf16 re-quantization of operands -> ~1e-2 rel deviation).
    ref_f32 = jnp.maximum(x @ w1 + b1, 0.0) @ w2 + b2
    assert jnp.allclose(out, ref_f32, atol=3e-2, rtol=3e-2)

    print("KERNEL_OK")
</pallas_src>

<mosaic_0001>
module attributes {stable_mosaic.version = 11 : i64} {
  func.func @_netc_kernel(%arg0: i32, %arg1: memref<2x32xf32, #tpu.memory_space<vmem>>, %arg2: memref<32x32xbf16, #tpu.memory_space<vmem>>, %arg3: memref<1x32xf32, #tpu.memory_space<vmem>>, %arg4: memref<32x10xbf16, #tpu.memory_space<vmem>>, %arg5: memref<1x10xf32, #tpu.memory_space<vmem>>, %arg6: memref<2x10xf32, #tpu.memory_space<vmem>>) attributes {dimension_semantics = [#tpu.dimension_semantics<parallel>], iteration_bounds = array<i64: 1>, scalar_prefetch = 0 : i64, scratch_operands = 0 : i64, tpu.core_type = #tpu.core_type<tc>, window_params = [{transform_indices = @transform_0, window_bounds = array<i64: 2, 32>}, {pipeline_mode = #tpu.pipeline_mode<synchronous>, transform_indices = @transform_1, window_bounds = array<i64: 32, 32>}, {pipeline_mode = #tpu.pipeline_mode<synchronous>, transform_indices = @transform_2, window_bounds = array<i64: 1, 32>}, {pipeline_mode = #tpu.pipeline_mode<synchronous>, transform_indices = @transform_3, window_bounds = array<i64: 32, 10>}, {pipeline_mode = #tpu.pipeline_mode<synchronous>, transform_indices = @transform_4, window_bounds = array<i64: 1, 10>}, {transform_indices = @transform_5, window_bounds = array<i64: 2, 10>}]} {
    %c0 = arith.constant 0 : index
    %c0_0 = arith.constant 0 : index
    %0 = vector.load %arg1[%c0, %c0_0] : memref<2x32xf32, #tpu.memory_space<vmem>>, vector<2x32xf32>
    %1 = arith.truncf %0 : vector<2x32xf32> to vector<2x32xbf16>
    %c0_1 = arith.constant 0 : index
    %c0_2 = arith.constant 0 : index
    %2 = vector.load %arg2[%c0_1, %c0_2] : memref<32x32xbf16, #tpu.memory_space<vmem>>, vector<32x32xbf16>
    %cst = arith.constant dense<0.000000e+00> : vector<2x32xf32>
    %3 = tpu.matmul %1, %2, %cst {dimension_numbers = #tpu.dot_dimension_numbers<[1], [0], [0], [1], [0, 0, 1, 1], [], []>} : vector<2x32xbf16>, vector<32x32xbf16>, vector<2x32xf32> -> vector<2x32xf32>
    %c0_3 = arith.constant 0 : index
    %c0_4 = arith.constant 0 : index
    %4 = vector.load %arg3[%c0_3, %c0_4] : memref<1x32xf32, #tpu.memory_space<vmem>>, vector<1x32xf32>
    %5 = vector.broadcast %4 : vector<1x32xf32> to vector<2x32xf32>
    %6 = arith.addf %3, %5 : vector<2x32xf32>
    %cst_5 = arith.constant 0.000000e+00 : f32
    %7 = vector.broadcast %cst_5 : f32 to vector<2x32xf32>
    %8 = arith.maximumf %6, %7 : vector<2x32xf32>
    %9 = arith.truncf %8 : vector<2x32xf32> to vector<2x32xbf16>
    %c0_6 = arith.constant 0 : index
    %c0_7 = arith.constant 0 : index
    %10 = vector.load %arg4[%c0_6, %c0_7] : memref<32x10xbf16, #tpu.memory_space<vmem>>, vector<32x10xbf16>
    %cst_8 = arith.constant dense<0.000000e+00> : vector<2x10xf32>
    %11 = tpu.matmul %9, %10, %cst_8 {dimension_numbers = #tpu.dot_dimension_numbers<[1], [0], [0], [1], [0, 0, 1, 1], [], []>} : vector<2x32xbf16>, vector<32x10xbf16>, vector<2x10xf32> -> vector<2x10xf32>
    %c0_9 = arith.constant 0 : index
    %c0_10 = arith.constant 0 : index
    %12 = vector.load %arg5[%c0_9, %c0_10] : memref<1x10xf32, #tpu.memory_space<vmem>>, vector<1x10xf32>
    %13 = vector.broadcast %12 : vector<1x10xf32> to vector<2x10xf32>
    %14 = arith.addf %11, %13 : vector<2x10xf32>
    %c0_11 = arith.constant 0 : index
    %c0_12 = arith.constant 0 : index
    %15 = vector.load %arg6[%c0_11, %c0_12] : memref<2x10xf32, #tpu.memory_space<vmem>>, vector<2x10xf32>
    tpu.vector_store %arg6[%c0_11, %c0_12], %14 {strides = array<i32>} : memref<2x10xf32, #tpu.memory_space<vmem>>, vector<2x10xf32>,
    return
  }
  func.func @transform_0(%arg0: i32) -> (i32, i32) {
    %c0_i32 = arith.constant 0 : i32
    %c0_i32_0 = arith.constant 0 : i32
    return %arg0, %c0_i32 : i32, i32
  }
  func.func @transform_1(%arg0: i32) -> (i32, i32) {
    %c0_i32 = arith.constant 0 : i32
    %c0_i32_0 = arith.constant 0 : i32
    %c0_i32_1 = arith.constant 0 : i32
    return %c0_i32, %c0_i32_0 : i32, i32
  }
  func.func @transform_2(%arg0: i32) -> (i32, i32) {
    %c0_i32 = arith.constant 0 : i32
    %c0_i32_0 = arith.constant 0 : i32
    %c0_i32_1 = arith.constant 0 : i32
    return %c0_i32, %c0_i32_0 : i32, i32
  }
  func.func @transform_3(%arg0: i32) -> (i32, i32) {
    %c0_i32 = arith.constant 0 : i32
    %c0_i32_0 = arith.constant 0 : i32
    %c0_i32_1 = arith.constant 0 : i32
    return %c0_i32, %c0_i32_0 : i32, i32
  }
  func.func @transform_4(%arg0: i32) -> (i32, i32) {
    %c0_i32 = arith.constant 0 : i32
    %c0_i32_0 = arith.constant 0 : i32
    %c0_i32_1 = arith.constant 0 : i32
    return %c0_i32, %c0_i32_0 : i32, i32
  }
  func.func @transform_5(%arg0: i32) -> (i32, i32) {
    %c0_i32 = arith.constant 0 : i32
    %c0_i32_0 = arith.constant 0 : i32
    return %arg0, %c0_i32 : i32, i32
  }
}

</mosaic_0001>

<bundles_post_ra>
// kernel: tpu_custom_call.1
= control target key start
LH: loop header
LB: loop body
LE: loop exit
PB: predicated region body
PF: predicated region fallthrough
CT: control target
= control target key end

     0   :  { %s223_s0 = inlined_call_operand.vmem [shape: f32[2,32], index: 0, kind: input, shape index: {}]   ;;  %s224_s1 = inlined_call_operand.vmem [shape: bf16[32,32], index: 1, kind: input, shape index: {}]   ;;  %s225_s2 = inlined_call_operand.vmem [shape: f32[1,32], index: 2, kind: input, shape index: {}]   ;;  %s226_s3 = inlined_call_operand.vmem [shape: bf16[32,10], index: 3, kind: input, shape index: {}]   ;;  %s227_s4 = inlined_call_operand.vmem [shape: f32[1,10], index: 4, kind: input, shape index: {}]   ;;  %s228_s5 = inlined_call_operand.hbm [shape: f32[2,10], index: 5, kind: output, shape index: {}]  }
   0x1   :  { %v136_v0 = vld [vmem:[%s224_s1 + $0x8] sm:$0xff]  ;;  %v135_v1 = vld [vmem:[%s224_s1] sm:$0xff] }
   0x2   :  { %54 = vmatpush.bf16.msra.mxu0 %v136_v0  ;;  %v22_v2 = vld [vmem:[%s223_s0] sm:$0x3] }
   0x3   :  { %10 = vsyncpa [#allocation3], 0  ;;  %v23_v3 = vpack.c.bf16 %v22_v2, %v22_v2  ;;  %vm44_vm0 = vcmask 261120   ;;  %v138_v4 = vld [vmem:[%s226_s3 + $0x8] sm:$0xff]  ;;  %v137_v5 = vld [vmem:[%s226_s3] sm:$0xff]  ;;  %s168_s30 = smov [#allocation2]  }
   0x4   :  { %92 = vmatpush.bf16.msra.mxu1 %v138_v4  ;;  %v140_v6 = vld [vmem:[%s225_s2] ss:$0 sm:$0xff]  ;;  %s106_s6 = sshll.u32 %s168_s30, 4  ;;  %s108_s3 = sshll.u32 %s228_s5, 4  ;;  %vm99_vm1 = vcmask 74752   ;;  %s107_s6 = int_to_ptr.vmem [resolvable:$true] %s106_s6  ;;  %s109_s3 = int_to_ptr.hbm [resolvable:$true] %s108_s3 }
   0x5   :  { %v141_v12 = vld [vmem:[%s227_s4] ss:$0 sm:$0xff] }
   0x6   :  { %55 = vmatpush.bf16.msra.mxu0 %v135_v1 }
   0x8   :  { %93 = vmatpush.bf16.msra.mxu1 %v137_v5 }
   0x9   :  { %125 = vmatmul.msk.bf16.vlgmr.msra.gmra.mxu0 %vm44_vm0, %v23_v3 }
  0x86   :  { %v57_v7 = vpop.f32.mrf.mxu0 }
  0x87   :  { %v58_v8 = vadd.f32 %v140_v6, %v57_v7 }
  0x89   :  { %v61_v9 = vmax.f32 %v58_v8, 0.0 }
  0x8b   :  { %v62_v10 = vpack.c.bf16 %v61_v9, %v61_v9 }
  0x8d   :  { %134 = vmatmul.msk.bf16.vlgmr.msra.gmra.mxu1 %vm44_vm0, %v62_v10 }
  0x8e   :  { %v59_v11 = vpop.f32.mrf.mxu0 }
 0x10a   :  { %v95_v13 = vpop.f32.mrf.mxu1 }
 0x10b   :  { %v96_v14 = vadd.f32 %v141_v12, %v95_v13 }
 0x10d   :  { %100 = vst.msk [vmem:[#allocation2] sm:$0x3] %vm99_vm1, %v96_v14 }
 0x10e   :  { %111 = dma.vmem_to_hbm [thread:$0]  %s107_s6, 32, %s109_s3, [#allocation3]  }
 0x112   :  { %v97_v15 = vpop.f32.mrf.mxu1 }
 0x113   :  { %166 = dma.done.wait [#allocation3], 32  }
 0x114   :  { %167 = vsyncadd [#allocation3], 4294967264 }
 0x115   :  { %116 = vsyncpa [#allocation3], 1 }

</bundles_post_ra>
